<compile_context>
chip_gen: v5e
topology: v5e:2x2
jax: 0.10.0
libtpu: 0.0.40
codegen_flags: <defaults>
</compile_context>

<pallas_src>
import jax
import jax.numpy as jnp
from jax.experimental import pallas as pl
from jax.experimental.pallas import tpu as pltpu


def _round_up(a: int, m: int) -> int:
    return ((a + m - 1) // m) * m


def linear_kernel(x_ref, w_ref, b_ref, o_ref, acc_ref):
    """One (i, j) output tile, accumulated over the k grid axis."""
    k = pl.program_id(2)

    @pl.when(k == 0)
    def _init():
        # Fold the bias into the accumulator init -> added exactly once,
        # on the VPU slot (free under an MXU-bound loop).
        acc_ref[...] = jnp.broadcast_to(
            b_ref[...].astype(jnp.float32), acc_ref.shape)

    acc_ref[...] += jnp.dot(
        x_ref[...], w_ref[...], preferred_element_type=jnp.float32)

    @pl.when(k == pl.num_programs(2) - 1)
    def _finalize():
        o_ref[...] = acc_ref[...].astype(o_ref.dtype)


def linear_a(x, w, b, *, tm=None, tn=None, tk=None):
    """y = x @ w + b, matching torch: x.matmul(w) + b.expand_as(x).

    Accepts x with arbitrary leading dims (last dim == in_dim).
    """
    K, N = w.shape
    lead_shape = x.shape[:-1]
    assert x.shape[-1] == K
    x2d = x.reshape(-1, K)
    M = x2d.shape[0]

    # Tile sizes: lane-aligned (128) on N/K, sublane-aligned (8) on M.
    # Modest caps keep double-buffered VMEM footprint tiny on every
    # generation (v5e 16 MiB scoped default .. v7x 64 MiB physical).
    if tm is None:
        tm = min(256, _round_up(M, 8))
    if tn is None:
        tn = min(128, _round_up(N, 128))
    if tk is None:
        tk = min(512, _round_up(K, 128))

    Mp, Kp, Np = _round_up(M, tm), _round_up(K, tk), _round_up(N, tn)

    # Zero-pad to tile multiples (zeros contribute nothing to the matmul;
    # padded output columns are sliced away below).
    x_p = x2d if (Mp, Kp) == (M, K) else jnp.pad(x2d, ((0, Mp - M), (0, Kp - K)))
    w_p = w if (Kp, Np) == (K, N) else jnp.pad(w, ((0, Kp - K), (0, Np - N)))
    b2d = b.reshape(1, N)
    b_p = b2d if Np == N else jnp.pad(b2d, ((0, 0), (0, Np - N)))

    grid = (Mp // tm, Np // tn, Kp // tk)  # reduction axis last

    out_p = pl.pallas_call(
        linear_kernel,
        out_shape=jax.ShapeDtypeStruct((Mp, Np), x.dtype),
        grid=grid,
        in_specs=[
            pl.BlockSpec((tm, tk), lambda i, j, k: (i, k)),   # x tile
            pl.BlockSpec((tk, tn), lambda i, j, k: (k, j)),   # w tile
            pl.BlockSpec((1, tn), lambda i, j, k: (0, j)),    # bias slice
        ],
        out_specs=pl.BlockSpec((tm, tn), lambda i, j, k: (i, j)),
        scratch_shapes=[pltpu.VMEM((tm, tn), jnp.float32)],
        compiler_params=pltpu.CompilerParams(
            dimension_semantics=("parallel", "parallel", "arbitrary"),
        ),
    )(x_p, w_p, b_p)

    return out_p[:M, :N].reshape(*lead_shape, N)


if __name__ == "__main__":
    key = jax.random.PRNGKey(0)
    k_x, k_w, k_b, k_x2, k_w2, k_b2 = jax.random.split(key, 6)

    # --- small case (module-sized): M=8, in_dim=32, out_dim=16 -------------
    M, in_dim, out_dim = 8, 32, 16
    x = jax.random.normal(k_x, (M, in_dim), dtype=jnp.float32)
    w = jax.random.normal(k_w, (in_dim, out_dim), dtype=jnp.float32)
    b = jax.random.normal(k_b, (out_dim,), dtype=jnp.float32)

    y = linear_a(x, w, b)
    jax.block_until_ready(y)
    y_ref = jnp.dot(x, w, precision=jax.lax.Precision.HIGHEST) + b
    assert y.shape == (M, out_dim)
    assert jnp.allclose(y, y_ref, atol=1e-3, rtol=1e-3), "small-case mismatch"

    # --- larger case: exercises multi-tile i/j/k grid + accumulator --------
    M2, K2, N2 = 256, 1024, 256
    x2 = jax.random.normal(k_x2, (M2, K2), dtype=jnp.float32)
    w2 = jax.random.normal(k_w2, (K2, N2), dtype=jnp.float32)
    b2 = jax.random.normal(k_b2, (N2,), dtype=jnp.float32)

    y2 = linear_a(x2, w2, b2)
    jax.block_until_ready(y2)
    y2_ref = jnp.dot(x2, w2, precision=jax.lax.Precision.HIGHEST) + b2
    assert y2.shape == (M2, N2)
    assert jnp.allclose(y2, y2_ref, atol=1e-3, rtol=1e-3), "large-case mismatch"

    print("KERNEL_OK")
</pallas_src>

<mosaic_0001>
module attributes {stable_mosaic.version = 11 : i64} {
  func.func @linear_kernel(%arg0: i32, %arg1: i32, %arg2: i32, %arg3: memref<8x128xf32, #tpu.memory_space<vmem>>, %arg4: memref<128x128xf32, #tpu.memory_space<vmem>>, %arg5: memref<1x128xf32, #tpu.memory_space<vmem>>, %arg6: memref<8x128xf32, #tpu.memory_space<vmem>>, %arg7: memref<8x128xf32, #tpu.memory_space<vmem>>) attributes {dimension_semantics = [#tpu.dimension_semantics<parallel>, #tpu.dimension_semantics<parallel>, #tpu.dimension_semantics<arbitrary>], iteration_bounds = array<i64: 1, 1, 1>, scalar_prefetch = 0 : i64, scratch_operands = 1 : i64, tpu.core_type = #tpu.core_type<tc>, window_params = [{transform_indices = @transform_0, window_bounds = array<i64: 8, 128>}, {transform_indices = @transform_1, window_bounds = array<i64: 128, 128>}, {transform_indices = @transform_2, window_bounds = array<i64: 1, 128>}, {transform_indices = @transform_3, window_bounds = array<i64: 8, 128>}]} {
    %c0_i32 = arith.constant 0 : i32
    %0 = arith.cmpi eq, %arg2, %c0_i32 : i32
    %1 = arith.extui %0 : i1 to i32
    %c0_i32_0 = arith.constant 0 : i32
    %2 = arith.cmpi ne, %1, %c0_i32_0 : i32
    scf.if %2 {
      %c0_10 = arith.constant 0 : index
      %c0_11 = arith.constant 0 : index
      %12 = vector.load %arg5[%c0_10, %c0_11] : memref<1x128xf32, #tpu.memory_space<vmem>>, vector<1x128xf32>
      %13 = vector.shape_cast %12 : vector<1x128xf32> to vector<1x128xf32>
      %14 = vector.broadcast %13 : vector<1x128xf32> to vector<8x128xf32>
      %c0_12 = arith.constant 0 : index
      %c0_13 = arith.constant 0 : index
      %15 = vector.load %arg7[%c0_12, %c0_13] : memref<8x128xf32, #tpu.memory_space<vmem>>, vector<8x128xf32>
      tpu.vector_store %arg7[%c0_12, %c0_13], %14 {strides = array<i32>} : memref<8x128xf32, #tpu.memory_space<vmem>>, vector<8x128xf32>,
    } else {
    }
    %c0 = arith.constant 0 : index
    %c0_1 = arith.constant 0 : index
    %3 = vector.load %arg7[%c0, %c0_1] : memref<8x128xf32, #tpu.memory_space<vmem>>, vector<8x128xf32>
    %c0_2 = arith.constant 0 : index
    %c0_3 = arith.constant 0 : index
    %4 = vector.load %arg3[%c0_2, %c0_3] : memref<8x128xf32, #tpu.memory_space<vmem>>, vector<8x128xf32>
    %c0_4 = arith.constant 0 : index
    %c0_5 = arith.constant 0 : index
    %5 = vector.load %arg4[%c0_4, %c0_5] : memref<128x128xf32, #tpu.memory_space<vmem>>, vector<128x128xf32>
    %cst = arith.constant dense<0.000000e+00> : vector<8x128xf32>
    %6 = tpu.matmul %4, %5, %cst {dimension_numbers = #tpu.dot_dimension_numbers<[1], [0], [0], [1], [0, 0, 1, 1], [], []>} : vector<8x128xf32>, vector<128x128xf32>, vector<8x128xf32> -> vector<8x128xf32>
    %7 = arith.addf %3, %6 : vector<8x128xf32>
    %c0_6 = arith.constant 0 : index
    %c0_7 = arith.constant 0 : index
    %8 = vector.load %arg7[%c0_6, %c0_7] : memref<8x128xf32, #tpu.memory_space<vmem>>, vector<8x128xf32>
    tpu.vector_store %arg7[%c0_6, %c0_7], %7 {strides = array<i32>} : memref<8x128xf32, #tpu.memory_space<vmem>>, vector<8x128xf32>,
    %c0_i32_8 = arith.constant 0 : i32
    %9 = arith.cmpi eq, %arg2, %c0_i32_8 : i32
    %10 = arith.extui %9 : i1 to i32
    %c0_i32_9 = arith.constant 0 : i32
    %11 = arith.cmpi ne, %10, %c0_i32_9 : i32
    scf.if %11 {
      %c0_10 = arith.constant 0 : index
      %c0_11 = arith.constant 0 : index
      %12 = vector.load %arg7[%c0_10, %c0_11] : memref<8x128xf32, #tpu.memory_space<vmem>>, vector<8x128xf32>
      %c0_12 = arith.constant 0 : index
      %c0_13 = arith.constant 0 : index
      %13 = vector.load %arg6[%c0_12, %c0_13] : memref<8x128xf32, #tpu.memory_space<vmem>>, vector<8x128xf32>
      tpu.vector_store %arg6[%c0_12, %c0_13], %12 {strides = array<i32>} : memref<8x128xf32, #tpu.memory_space<vmem>>, vector<8x128xf32>,
    } else {
    }
    return
  }
  func.func @transform_0(%arg0: i32, %arg1: i32, %arg2: i32) -> (i32, i32) {
    %c0_i32 = arith.constant 0 : i32
    return %arg0, %arg2 : i32, i32
  }
  func.func @transform_1(%arg0: i32, %arg1: i32, %arg2: i32) -> (i32, i32) {
    %c0_i32 = arith.constant 0 : i32
    return %arg2, %arg1 : i32, i32
  }
  func.func @transform_2(%arg0: i32, %arg1: i32, %arg2: i32) -> (i32, i32) {
    %c0_i32 = arith.constant 0 : i32
    %c0_i32_0 = arith.constant 0 : i32
    return %c0_i32, %arg1 : i32, i32
  }
  func.func @transform_3(%arg0: i32, %arg1: i32, %arg2: i32) -> (i32, i32) {
    %c0_i32 = arith.constant 0 : i32
    return %arg0, %arg1 : i32, i32
  }
}

</mosaic_0001>

<bundles_post_ra>
// kernel: tpu_custom_call.1
= control target key start
LH: loop header
LB: loop body
LE: loop exit
PB: predicated region body
PF: predicated region fallthrough
CT: control target
= control target key end

     0   :  { %8 = vsyncpa [#allocation4], 0  ;;  %s238_s0 = inlined_call_operand.hbm [shape: f32[8,128], index: 0, kind: input, shape index: {}]   ;;  %s239_s1 = inlined_call_operand.hbm [shape: f32[128,128], index: 1, kind: input, shape index: {}]   ;;  %s240_s2 = inlined_call_operand.vmem [shape: f32[1,128], index: 2, kind: input, shape index: {}]   ;;  %s241_s3 = inlined_call_operand.hbm [shape: f32[8,128], index: 3, kind: output, shape index: {}]  }
   0x1   :  { %9 = vsyncpa [#allocation7], 0 }
   0x2   :  { %10 = vsyncpa [#allocation5], 0  ;;  %s16_s14 = sshll.u32 %s238_s0, 4  ;;  %s201_s15 = smov [#allocation3]   ;;  %s17_s14 = int_to_ptr.hbm [resolvable:$true] %s16_s14 }
   0x3   :  { %s18_s16 = sshll.u32 %s201_s15, 4  ;;  %s26_s19 = sshll.u32 %s239_s1, 4  ;;  %s19_s16 = int_to_ptr.vmem [resolvable:$true] %s18_s16  ;;  %s27_s19 = int_to_ptr.hbm [resolvable:$true] %s26_s19 }
   0x4   :  { %21 = dma.hbm_to_vmem [thread:$0]  %s17_s14, 128, %s19_s16, [#allocation4]  }
   0x5   :  { %s202_s20 = smov [#allocation6]   ;;  %s203_s22 = smov 128  }
   0x6   :  { %s28_s21 = sshll.u32 %s202_s20, 4  ;;  %s204_s23 = smov 8   ;;  %s29_s21 = int_to_ptr.vmem [resolvable:$true] %s28_s21 }
   0x7   :  { %34 = dma.hbm_to_vmem [thread:$0]  %s27_s19, 2048, %s29_s21, [#allocation7], %s203_s22, %s203_s22, %s204_s23  }
   0x8   :  { %195 = dma.done.wait [#allocation4], 128  }
   0x9   :  { %196 = vsyncadd [#allocation4], 4294967168 }
   0xa   :  { %197 = dma.done.wait [#allocation7], 2048  }
   0xb   :  { %198 = vsyncadd [#allocation7], 4294965248  ;;  %v71_v0 = vld [vmem:[#allocation6 + $0x78] sm:$0xff]  ;;  %v70_v1 = vld [vmem:[#allocation6 + $0x70] sm:$0xff]  ;;  %s205_s24 = smov [#allocation8]   ;;  %s106_s28 = sshll.u32 %s241_s3, 4  ;;  %s107_s28 = int_to_ptr.hbm [resolvable:$true] %s106_s28 }
   0xc   :  { %72 = vmatpush.msra.mxu0 %v71_v0  ;;  %v69_v2 = vld [vmem:[#allocation6 + $0x68] sm:$0xff]  ;;  %v68_v3 = vld [vmem:[#allocation6 + $0x60] sm:$0xff]  ;;  %v67_v4 = vld [vmem:[#allocation6 + $0x58] sm:$0xff]  ;;  %s104_s25 = sshll.u32 %s205_s24, 4  ;;  %s105_s25 = int_to_ptr.vmem [resolvable:$true] %s104_s25 }
   0xd   :  { %v66_v5 = vld [vmem:[#allocation6 + $0x50] sm:$0xff]  ;;  %v65_v6 = vld [vmem:[#allocation6 + $0x48] sm:$0xff]  ;;  %v64_v7 = vld [vmem:[#allocation6 + $0x40] sm:$0xff] }
   0xe   :  { %73 = vmatpush.msra.mxu0 %v70_v1  ;;  %v63_v8 = vld [vmem:[#allocation6 + $0x38] sm:$0xff]  ;;  %v62_v9 = vld [vmem:[#allocation6 + $0x30] sm:$0xff]  ;;  %v61_v10 = vld [vmem:[#allocation6 + $0x28] sm:$0xff] }
   0xf   :  { %v60_v11 = vld [vmem:[#allocation6 + $0x20] sm:$0xff]  ;;  %v59_v12 = vld [vmem:[#allocation6 + $0x18] sm:$0xff]  ;;  %v58_v13 = vld [vmem:[#allocation6 + $0x10] sm:$0xff] }
  0x10   :  { %74 = vmatpush.msra.mxu0 %v69_v2  ;;  %v57_v14 = vld [vmem:[#allocation6 + $0x8] sm:$0xff]  ;;  %v56_v15 = vld [vmem:[#allocation6] sm:$0xff]  ;;  %v55_v16 = vld [vmem:[#allocation3] sm:$0xff] }
  0x11   :  { %v122_v17 = vld [vmem:[%s240_s2] ss:$0 sm:$0xff] }
  0x12   :  { %75 = vmatpush.msra.mxu0 %v68_v3 }
  0x14   :  { %76 = vmatpush.msra.mxu0 %v67_v4 }
  0x16   :  { %77 = vmatpush.msra.mxu0 %v66_v5 }
  0x18   :  { %78 = vmatpush.msra.mxu0 %v65_v6 }
  0x1a   :  { %79 = vmatpush.msra.mxu0 %v64_v7 }
  0x1c   :  { %80 = vmatpush.msra.mxu0 %v63_v8 }
  0x1e   :  { %81 = vmatpush.msra.mxu0 %v62_v9 }
  0x20   :  { %82 = vmatpush.msra.mxu0 %v61_v10 }
  0x22   :  { %83 = vmatpush.msra.mxu0 %v60_v11 }
  0x24   :  { %84 = vmatpush.msra.mxu0 %v59_v12 }
  0x26   :  { %85 = vmatpush.msra.mxu0 %v58_v13 }
  0x28   :  { %86 = vmatpush.msra.mxu0 %v57_v14 }
  0x2a   :  { %87 = vmatpush.msra.mxu0 %v56_v15 }
  0x2b   :  { %88 = vmatmul.f32.vlgmr.msra.gmra.mxu0 %v55_v16 }
  0xa8   :  { %v89_v18 = vpop.f32.mrf.mxu0 }
  0xa9   :  { %v92_v19 = vadd.f32 %v122_v17, %v89_v18 }
  0xab   :  { %98 = vst [vmem:[#allocation8] sm:$0xff] %v92_v19 }
  0xac   :  { %109 = dma.vmem_to_hbm [thread:$0]  %s105_s25, 128, %s107_s28, [#allocation5]  }
  0xad   :  { %199 = dma.done.wait [#allocation5], 128  }
  0xae   :  { %200 = vsyncadd [#allocation5], 4294967168 }
  0xaf   :  { %114 = vsyncpa [#allocation4], 1 }
  0xb0   :  { %115 = vsyncpa [#allocation7], 1 }
  0xb1   :  { %116 = vsyncpa [#allocation5], 1 }

</bundles_post_ra>
